<compile_context>
chip_gen: v7x
topology: tpu7x:2x2x1
jax: 0.10.0
libtpu: 0.0.40
codegen_flags: <defaults>
</compile_context>

<pallas_src>
import functools

import jax
import jax.numpy as jnp
from jax import lax
from jax.experimental import pallas as pl
from jax.experimental.pallas import tpu as pltpu

EPS = 1e-5


def _temporal_block_kernel(*refs, k, d, L, has_downsample, compute_dtype):
    """One grid step processes a (C, block_b*L) slab (batch folded onto lanes).

    refs (when has_downsample=True):
      x_ref  : (C_in,  N)       N = block_b * L; batch-major length-L segments
      w1_ref : (C_out, k*C_in)  conv1 weight (weight-norm + bias + BN1 folded),
                                tap-major columns
      b1_ref : (C_out, 1)
      w2_ref : (C_out, k*C_out) conv2 weight (BN2 folded), tap-major columns
      b2_ref : (C_out, 1)
      wd_ref : (C_out, C_in)    1x1 downsample (only when C_in != C_out)
      bd_ref : (C_out, 1)
      out_ref: (C_out, N)
    """
    if has_downsample:
        x_ref, w1_ref, b1_ref, w2_ref, b2_ref, wd_ref, bd_ref, out_ref = refs
    else:
        x_ref, w1_ref, b1_ref, w2_ref, b2_ref, out_ref = refs

    x = x_ref[...].astype(jnp.float32)                       # (C_in, N)
    N = x.shape[1]
    # Lane position within each length-L batch segment.
    col = lax.broadcasted_iota(jnp.int32, (1, N), 1) % L

    def causal_im2col(y):
        """y: (C, N) -> (k*C, N).  Tap i is y shifted right by (k-1-i)*d within
        each length-L segment with zero fill (== causal left-pad + chomp).
        Shift = XLU roll + one VPU select; the segment mask also zeroes any
        cross-segment leakage from the roll wrap-around."""
        rows = []
        for i in range(k):
            s = (k - 1 - i) * d
            if s == 0:
                rows.append(y)
            elif s >= L:
                rows.append(jnp.zeros_like(y))
            else:
                rolled = pltpu.roll(y, shift=s, axis=1)
                rows.append(jnp.where(col >= s, rolled, jnp.zeros_like(rolled)))
        return jnp.concatenate(rows, axis=0)                  # (k*C, N), sublane concat

    w1 = w1_ref[...]
    b1 = b1_ref[...]
    w2 = w2_ref[...]
    b2 = b2_ref[...]

    # conv1 (+ folded bias/BN1) + ReLU — one wide MXU matmul (N lanes).
    h = jnp.dot(w1, causal_im2col(x).astype(compute_dtype),
                preferred_element_type=jnp.float32) + b1
    h = jnp.maximum(h, 0.0)                                   # dropout1 = identity (eval)

    # conv2 (+ folded bias/BN2) + ReLU — one wide MXU matmul.
    h2 = jnp.dot(w2, causal_im2col(h).astype(compute_dtype),
                 preferred_element_type=jnp.float32) + b2
    h2 = jnp.maximum(h2, 0.0)                                 # dropout2 = identity (eval)

    # Residual path: 1x1 conv only when C_in != C_out; identity otherwise
    # (no matmul against an identity matrix, residual accumulated in f32).
    if has_downsample:
        res = jnp.dot(wd_ref[...], x.astype(compute_dtype),
                      preferred_element_type=jnp.float32) + bd_ref[...]
    else:
        res = x

    out_ref[...] = jnp.maximum(h2 + res, 0.0).astype(out_ref.dtype)


def _working_set_bytes(block_b, L, C_in, C_out, k):
    """Rough f32 per-step VMEM working set: double-buffered in/out blocks plus
    in-kernel im2col and h/h2/res temporaries."""
    n = block_b * L
    return 4 * n * (2 * (C_in + C_out) + k * (C_in + C_out) + 3 * C_out)


def _pick_block_b(B, L, C_in, C_out, k, vmem_budget_bytes=48 * 1024 * 1024):
    """Pick the batch block: (block_b*L) must satisfy the (8,128) lane rule
    (multiple of 128 or the full extent), the working set must fit the budget
    (v7x-safe), and we prefer >= 2 grid steps so v7x's 2 TensorCores both get
    work from the "parallel" batch axis."""
    valid = [bb for bb in range(B, 0, -1)
             if B % bb == 0 and (bb == B or (bb * L) % 128 == 0)]
    fitting = [bb for bb in valid
               if _working_set_bytes(bb, L, C_in, C_out, k) <= vmem_budget_bytes]
    fitting = fitting or [valid[-1]]
    for bb in fitting:                                        # largest bb with >= 2 steps
        if B // bb >= 2:
            return bb
    return fitting[0]


def temporal_block(x_ncl, kparams, *, kernel_size, dilation, block_b=None,
                   use_bf16=False):
    """x_ncl: (B, C_in, L) float32 -> (B, C_out, L) float32 (NCL in, NCL out)."""
    w1r, b1f, w2r, b2f, wdr, bdf = kparams
    has_downsample = wdr is not None
    B, C_in, L = x_ncl.shape
    C_out = w1r.shape[0]
    k, d = kernel_size, dilation

    if block_b is None:
        block_b = _pick_block_b(B, L, C_in, C_out, k)
    assert B % block_b == 0 and (block_b == B or (block_b * L) % 128 == 0), (B, L, block_b)
    N_blk = block_b * L

    # Fold batch onto the lane axis (wrapper-side layout plumbing): every conv
    # becomes one lane-dense matmul and every output store is lane-dense.
    x2d = jnp.transpose(x_ncl.astype(jnp.float32), (1, 0, 2)).reshape(C_in, B * L)

    compute_dtype = jnp.bfloat16 if use_bf16 else jnp.float32
    w1k = w1r.astype(compute_dtype)
    w2k = w2r.astype(compute_dtype)

    kernel = functools.partial(_temporal_block_kernel, k=k, d=d, L=L,
                               has_downsample=has_downsample,
                               compute_dtype=compute_dtype)

    operands = [x2d, w1k, b1f, w2k, b2f]
    in_specs = [
        pl.BlockSpec((C_in, N_blk), lambda g: (0, g)),
        pl.BlockSpec(w1k.shape, lambda g: (0, 0)),
        pl.BlockSpec(b1f.shape, lambda g: (0, 0)),
        pl.BlockSpec(w2k.shape, lambda g: (0, 0)),
        pl.BlockSpec(b2f.shape, lambda g: (0, 0)),
    ]
    weight_bytes = (w1k.size * w1k.dtype.itemsize + w2k.size * w2k.dtype.itemsize
                    + 4 * (b1f.size + b2f.size))
    if has_downsample:
        wdk = wdr.astype(compute_dtype)
        operands += [wdk, bdf]
        in_specs += [pl.BlockSpec(wdk.shape, lambda g: (0, 0)),
                     pl.BlockSpec(bdf.shape, lambda g: (0, 0))]
        weight_bytes += wdk.size * wdk.dtype.itemsize + 4 * bdf.size

    # Scoped-VMEM limit: never below the 32 MiB default, raised up to 64 MiB
    # (v7x-safe) when per-step blocks are large.
    need_bytes = _working_set_bytes(block_b, L, C_in, C_out, k)
    vmem_limit = int(min(max(2 * need_bytes + 2 * weight_bytes, 32 * 1024 * 1024),
                         64 * 1024 * 1024))

    out2d = pl.pallas_call(
        kernel,
        out_shape=jax.ShapeDtypeStruct((C_out, B * L), jnp.float32),
        grid_spec=pltpu.PrefetchScalarGridSpec(
            num_scalar_prefetch=0,
            grid=(B // block_b,),
            in_specs=in_specs,
            out_specs=pl.BlockSpec((C_out, N_blk), lambda g: (0, g)),
        ),
        compiler_params=pltpu.CompilerParams(
            dimension_semantics=("parallel",),       # batch blocks are independent
            vmem_limit_bytes=vmem_limit,
        ),
    )(*operands)

    return jnp.transpose(out2d.reshape(C_out, B, L), (1, 0, 2))   # back to (B, C_out, L)


def init_params(key, n_inputs, n_outputs, kernel_size):
    """Deterministic parameter init (shapes as in the PyTorch module)."""
    ks = jax.random.split(key, 8)

    def weight_normed(k_v, k_g, shape):
        v = 0.01 * jax.random.normal(k_v, shape, jnp.float32)        # (C_out, C_in, K)
        norm = jnp.sqrt(jnp.sum(v * v, axis=(1, 2), keepdims=True))
        g = norm * (1.0 + 0.5 * jnp.abs(jax.random.normal(k_g, norm.shape, jnp.float32)))
        return g * v / norm                                          # w = g * v / ||v||

    w1 = weight_normed(ks[0], ks[1], (n_outputs, n_inputs, kernel_size))
    b1 = 0.01 * jax.random.normal(ks[2], (n_outputs,), jnp.float32)
    w2 = weight_normed(ks[3], ks[4], (n_outputs, n_outputs, kernel_size))
    b2 = 0.01 * jax.random.normal(ks[5], (n_outputs,), jnp.float32)

    if n_inputs != n_outputs:
        wd = 0.01 * jax.random.normal(ks[6], (n_outputs, n_inputs, 1), jnp.float32)
        bd = 0.01 * jax.random.normal(ks[7], (n_outputs,), jnp.float32)
    else:
        wd, bd = None, None                                          # identity residual

    # BatchNorm (PyTorch defaults, eval mode): gamma=1, beta=0, mean=0, var=1.
    scale = jnp.ones((n_outputs,), jnp.float32) / jnp.sqrt(1.0 + EPS)
    shift = jnp.zeros((n_outputs,), jnp.float32)

    raw = (w1, b1, w2, b2, wd, bd)

    # Fold bias + eval-mode BN into the conv weights; reshape to the im2col
    # layout expected by the kernel: (C_out, K*C_in), tap-major columns.
    def fold(w_oik, b, sc, sh):
        wf = w_oik * sc[:, None, None]
        bf = b * sc + sh
        return jnp.transpose(wf, (0, 2, 1)).reshape(w_oik.shape[0], -1), bf[:, None]

    w1r, b1f = fold(w1, b1, scale, shift)
    w2r, b2f = fold(w2, b2, scale, shift)
    if wd is not None:
        wdr, bdf = wd[:, :, 0], bd[:, None]
    else:
        wdr, bdf = None, None

    return raw, (w1r, b1f, w2r, b2f, wdr, bdf)


def reference(x, raw, *, kernel_size, dilation, padding):
    """Pure-JAX reference mirroring the PyTorch forward (eval semantics)."""
    w1, b1, w2, b2, wd, bd = raw
    L = x.shape[2]

    def conv1d(inp, w, b, pad, dil):
        y = lax.conv_general_dilated(inp, w, window_strides=(1,),
                                     padding=[(pad, pad)], rhs_dilation=(dil,),
                                     dimension_numbers=('NCH', 'OIH', 'NCH'))
        return y + b[None, :, None]

    y = conv1d(x, w1, b1, padding, dilation)[:, :, :L]        # chomp1
    y = jnp.maximum(y / jnp.sqrt(1.0 + EPS), 0.0)             # BN1 (eval) + ReLU
    y = conv1d(y, w2, b2, padding, dilation)[:, :, :L]        # chomp2
    y = jnp.maximum(y / jnp.sqrt(1.0 + EPS), 0.0)             # BN2 (eval) + ReLU
    res = x if wd is None else conv1d(x, wd, bd, 0, 1)        # identity / downsample
    return jnp.maximum(y + res, 0.0)


if __name__ == "__main__":
    key = jax.random.PRNGKey(0)

    cases = [
        # C_in != C_out: 1x1 downsample residual path, f32 MXU inputs
        dict(name="downsample_f32", B=2, C_in=4, C_out=8, L=128, K=3, DIL=2,
             use_bf16=False, atol=1e-4, rtol=1e-4),
        # C_in == C_out: identity residual (no downsample matmul in the kernel)
        dict(name="identity_f32", B=2, C_in=8, C_out=8, L=128, K=3, DIL=2,
             use_bf16=False, atol=1e-4, rtol=1e-4),
        # bf16 MXU inputs / f32 accumulation (v5e/v6e/v7x fast path), looser tol
        dict(name="downsample_bf16", B=2, C_in=4, C_out=8, L=128, K=3, DIL=2,
             use_bf16=True, atol=2e-2, rtol=2e-2),
    ]

    for idx, c in enumerate(cases):
        k_x, k_p = jax.random.split(jax.random.fold_in(key, idx))
        x = jax.random.normal(k_x, (c["B"], c["C_in"], c["L"]), jnp.float32)
        raw, kparams = init_params(k_p, c["C_in"], c["C_out"], c["K"])

        out = temporal_block(x, kparams, kernel_size=c["K"], dilation=c["DIL"],
                             use_bf16=c["use_bf16"])
        out = jax.block_until_ready(out)

        ref = reference(x, raw, kernel_size=c["K"], dilation=c["DIL"],
                        padding=(c["K"] - 1) * c["DIL"])
        assert out.shape == ref.shape, (c["name"], out.shape, ref.shape)
        max_err = float(jnp.max(jnp.abs(out - ref)))
        assert jnp.allclose(out, ref, atol=c["atol"], rtol=c["rtol"]), (c["name"], max_err)

    print("KERNEL_OK")
</pallas_src>

<mosaic_0001>
module attributes {stable_mosaic.version = 11 : i64} {
  func.func @_temporal_block_kernel(%arg0: i32, %arg1: memref<4x128xf32, #tpu.memory_space<vmem>>, %arg2: memref<8x12xf32, #tpu.memory_space<vmem>>, %arg3: memref<8x1xf32, #tpu.memory_space<vmem>>, %arg4: memref<8x24xf32, #tpu.memory_space<vmem>>, %arg5: memref<8x1xf32, #tpu.memory_space<vmem>>, %arg6: memref<8x4xf32, #tpu.memory_space<vmem>>, %arg7: memref<8x1xf32, #tpu.memory_space<vmem>>, %arg8: memref<8x128xf32, #tpu.memory_space<vmem>>) attributes {dimension_semantics = [#tpu.dimension_semantics<parallel>], iteration_bounds = array<i64: 2>, scalar_prefetch = 0 : i64, scratch_operands = 0 : i64, tpu.core_type = #tpu.core_type<tc>, window_params = [{transform_indices = @transform_0, window_bounds = array<i64: 4, 128>}, {pipeline_mode = #tpu.pipeline_mode<synchronous>, transform_indices = @transform_1, window_bounds = array<i64: 8, 12>}, {pipeline_mode = #tpu.pipeline_mode<synchronous>, transform_indices = @transform_2, window_bounds = array<i64: 8, 1>}, {pipeline_mode = #tpu.pipeline_mode<synchronous>, transform_indices = @transform_3, window_bounds = array<i64: 8, 24>}, {pipeline_mode = #tpu.pipeline_mode<synchronous>, transform_indices = @transform_4, window_bounds = array<i64: 8, 1>}, {pipeline_mode = #tpu.pipeline_mode<synchronous>, transform_indices = @transform_5, window_bounds = array<i64: 8, 4>}, {pipeline_mode = #tpu.pipeline_mode<synchronous>, transform_indices = @transform_6, window_bounds = array<i64: 8, 1>}, {transform_indices = @transform_7, window_bounds = array<i64: 8, 128>}]} {
    %c0 = arith.constant 0 : index
    %c0_0 = arith.constant 0 : index
    %0 = vector.load %arg1[%c0, %c0_0] : memref<4x128xf32, #tpu.memory_space<vmem>>, vector<4x128xf32>
    %1 = tpu.iota {dimensions = array<i32: 1>} : vector<1x128xi32>
    %c128_i32 = arith.constant 128 : i32
    %c0_i32 = arith.constant 0 : i32
    %2 = arith.cmpi eq, %c128_i32, %c0_i32 : i32
    %c1_i32 = arith.constant 1 : i32
    %3 = arith.select %2, %c1_i32, %c128_i32 : i32
    %4 = vector.broadcast %3 : i32 to vector<1x128xi32>
    %5 = arith.remsi %1, %4 : vector<1x128xi32>
    %c0_i32_1 = arith.constant 0 : i32
    %6 = vector.broadcast %c0_i32_1 : i32 to vector<1x128xi32>
    %7 = arith.cmpi ne, %5, %6 : vector<1x128xi32>
    %c0_i32_2 = arith.constant 0 : i32
    %8 = vector.broadcast %c0_i32_2 : i32 to vector<1x128xi32>
    %9 = arith.cmpi slt, %5, %8 : vector<1x128xi32>
    %c0_i32_3 = arith.constant 0 : i32
    %10 = arith.cmpi slt, %3, %c0_i32_3 : i32
    %11 = vector.broadcast %10 : i1 to vector<1x128xi1>
    %12 = vector.broadcast %11 : vector<1x128xi1> to vector<1x128xi1>
    %13 = arith.xori %9, %12 : vector<1x128xi1>
    %14 = arith.andi %13, %7 : vector<1x128xi1>
    %15 = vector.broadcast %3 : i32 to vector<1x128xi32>
    %16 = arith.addi %5, %15 : vector<1x128xi32>
    %17 = arith.select %14, %16, %5 : vector<1x128xi1>, vector<1x128xi32>
    %c0_4 = arith.constant 0 : index
    %c0_5 = arith.constant 0 : index
    %18 = vector.load %arg2[%c0_4, %c0_5] : memref<8x12xf32, #tpu.memory_space<vmem>>, vector<8x12xf32>
    %c0_6 = arith.constant 0 : index
    %c0_7 = arith.constant 0 : index
    %19 = vector.load %arg3[%c0_6, %c0_7] : memref<8x1xf32, #tpu.memory_space<vmem>>, vector<8x1xf32>
    %c0_8 = arith.constant 0 : index
    %c0_9 = arith.constant 0 : index
    %20 = vector.load %arg4[%c0_8, %c0_9] : memref<8x24xf32, #tpu.memory_space<vmem>>, vector<8x24xf32>
    %c0_10 = arith.constant 0 : index
    %c0_11 = arith.constant 0 : index
    %21 = vector.load %arg5[%c0_10, %c0_11] : memref<8x1xf32, #tpu.memory_space<vmem>>, vector<8x1xf32>
    %c4_i32 = arith.constant 4 : i32
    %22 = tpu.dynamic_rotate %0 by %c4_i32 dim 1 : vector<4x128xf32>, i32 -> vector<4x128xf32>
    %c4_i32_12 = arith.constant 4 : i32
    %23 = vector.broadcast %c4_i32_12 : i32 to vector<1x128xi32>
    %24 = arith.cmpi sge, %17, %23 : vector<1x128xi32>
    %cst = arith.constant 0.000000e+00 : f32
    %25 = vector.broadcast %cst : f32 to vector<4x128xf32>
    %26 = vector.shape_cast %24 : vector<1x128xi1> to vector<1x128xi1>
    %27 = vector.broadcast %26 : vector<1x128xi1> to vector<4x128xi1>
    %28 = arith.select %27, %22, %25 : vector<4x128xi1>, vector<4x128xf32>
    %c2_i32 = arith.constant 2 : i32
    %29 = tpu.dynamic_rotate %0 by %c2_i32 dim 1 : vector<4x128xf32>, i32 -> vector<4x128xf32>
    %c2_i32_13 = arith.constant 2 : i32
    %30 = vector.broadcast %c2_i32_13 : i32 to vector<1x128xi32>
    %31 = arith.cmpi sge, %17, %30 : vector<1x128xi32>
    %cst_14 = arith.constant 0.000000e+00 : f32
    %32 = vector.broadcast %cst_14 : f32 to vector<4x128xf32>
    %33 = vector.shape_cast %31 : vector<1x128xi1> to vector<1x128xi1>
    %34 = vector.broadcast %33 : vector<1x128xi1> to vector<4x128xi1>
    %35 = arith.select %34, %29, %32 : vector<4x128xi1>, vector<4x128xf32>
    %36 = tpu.concatenate %28, %35, %0 in 0 : vector<4x128xf32>, vector<4x128xf32>, vector<4x128xf32> -> vector<12x128xf32>
    %cst_15 = arith.constant dense<0.000000e+00> : vector<8x128xf32>
    %37 = tpu.matmul %18, %36, %cst_15 {dimension_numbers = #tpu.dot_dimension_numbers<[1], [0], [0], [1], [0, 0, 1, 1], [], []>} : vector<8x12xf32>, vector<12x128xf32>, vector<8x128xf32> -> vector<8x128xf32>
    %38 = vector.broadcast %19 : vector<8x1xf32> to vector<8x128xf32>
    %39 = arith.addf %37, %38 : vector<8x128xf32>
    %cst_16 = arith.constant 0.000000e+00 : f32
    %40 = vector.broadcast %cst_16 : f32 to vector<8x128xf32>
    %41 = arith.maximumf %39, %40 : vector<8x128xf32>
    %c4_i32_17 = arith.constant 4 : i32
    %42 = tpu.dynamic_rotate %41 by %c4_i32_17 dim 1 : vector<8x128xf32>, i32 -> vector<8x128xf32>
    %c4_i32_18 = arith.constant 4 : i32
    %43 = vector.broadcast %c4_i32_18 : i32 to vector<1x128xi32>
    %44 = arith.cmpi sge, %17, %43 : vector<1x128xi32>
    %cst_19 = arith.constant 0.000000e+00 : f32
    %45 = vector.broadcast %cst_19 : f32 to vector<8x128xf32>
    %46 = vector.shape_cast %44 : vector<1x128xi1> to vector<1x128xi1>
    %47 = vector.broadcast %46 : vector<1x128xi1> to vector<8x128xi1>
    %48 = arith.select %47, %42, %45 : vector<8x128xi1>, vector<8x128xf32>
    %c2_i32_20 = arith.constant 2 : i32
    %49 = tpu.dynamic_rotate %41 by %c2_i32_20 dim 1 : vector<8x128xf32>, i32 -> vector<8x128xf32>
    %c2_i32_21 = arith.constant 2 : i32
    %50 = vector.broadcast %c2_i32_21 : i32 to vector<1x128xi32>
    %51 = arith.cmpi sge, %17, %50 : vector<1x128xi32>
    %cst_22 = arith.constant 0.000000e+00 : f32
    %52 = vector.broadcast %cst_22 : f32 to vector<8x128xf32>
    %53 = vector.shape_cast %51 : vector<1x128xi1> to vector<1x128xi1>
    %54 = vector.broadcast %53 : vector<1x128xi1> to vector<8x128xi1>
    %55 = arith.select %54, %49, %52 : vector<8x128xi1>, vector<8x128xf32>
    %56 = tpu.concatenate %48, %55, %41 in 0 : vector<8x128xf32>, vector<8x128xf32>, vector<8x128xf32> -> vector<24x128xf32>
    %cst_23 = arith.constant dense<0.000000e+00> : vector<8x128xf32>
    %57 = tpu.matmul %20, %56, %cst_23 {dimension_numbers = #tpu.dot_dimension_numbers<[1], [0], [0], [1], [0, 0, 1, 1], [], []>} : vector<8x24xf32>, vector<24x128xf32>, vector<8x128xf32> -> vector<8x128xf32>
    %58 = vector.broadcast %21 : vector<8x1xf32> to vector<8x128xf32>
    %59 = arith.addf %57, %58 : vector<8x128xf32>
    %cst_24 = arith.constant 0.000000e+00 : f32
    %60 = vector.broadcast %cst_24 : f32 to vector<8x128xf32>
    %61 = arith.maximumf %59, %60 : vector<8x128xf32>
    %c0_25 = arith.constant 0 : index
    %c0_26 = arith.constant 0 : index
    %62 = vector.load %arg6[%c0_25, %c0_26] : memref<8x4xf32, #tpu.memory_space<vmem>>, vector<8x4xf32>
    %cst_27 = arith.constant dense<0.000000e+00> : vector<8x128xf32>
    %63 = tpu.matmul %62, %0, %cst_27 {dimension_numbers = #tpu.dot_dimension_numbers<[1], [0], [0], [1], [0, 0, 1, 1], [], []>} : vector<8x4xf32>, vector<4x128xf32>, vector<8x128xf32> -> vector<8x128xf32>
    %c0_28 = arith.constant 0 : index
    %c0_29 = arith.constant 0 : index
    %64 = vector.load %arg7[%c0_28, %c0_29] : memref<8x1xf32, #tpu.memory_space<vmem>>, vector<8x1xf32>
    %65 = vector.broadcast %64 : vector<8x1xf32> to vector<8x128xf32>
    %66 = arith.addf %63, %65 : vector<8x128xf32>
    %67 = arith.addf %61, %66 : vector<8x128xf32>
    %cst_30 = arith.constant 0.000000e+00 : f32
    %68 = vector.broadcast %cst_30 : f32 to vector<8x128xf32>
    %69 = arith.maximumf %67, %68 : vector<8x128xf32>
    %c0_31 = arith.constant 0 : index
    %c0_32 = arith.constant 0 : index
    %70 = vector.load %arg8[%c0_31, %c0_32] : memref<8x128xf32, #tpu.memory_space<vmem>>, vector<8x128xf32>
    tpu.vector_store %arg8[%c0_31, %c0_32], %69 {strides = array<i32>} : memref<8x128xf32, #tpu.memory_space<vmem>>, vector<8x128xf32>,
    return
  }
  func.func @transform_0(%arg0: i32) -> (i32, i32) {
    %c0_i32 = arith.constant 0 : i32
    %c0_i32_0 = arith.constant 0 : i32
    return %c0_i32, %arg0 : i32, i32
  }
  func.func @transform_1(%arg0: i32) -> (i32, i32) {
    %c0_i32 = arith.constant 0 : i32
    %c0_i32_0 = arith.constant 0 : i32
    %c0_i32_1 = arith.constant 0 : i32
    return %c0_i32, %c0_i32_0 : i32, i32
  }
  func.func @transform_2(%arg0: i32) -> (i32, i32) {
    %c0_i32 = arith.constant 0 : i32
    %c0_i32_0 = arith.constant 0 : i32
    %c0_i32_1 = arith.constant 0 : i32
    return %c0_i32, %c0_i32_0 : i32, i32
  }
  func.func @transform_3(%arg0: i32) -> (i32, i32) {
    %c0_i32 = arith.constant 0 : i32
    %c0_i32_0 = arith.constant 0 : i32
    %c0_i32_1 = arith.constant 0 : i32
    return %c0_i32, %c0_i32_0 : i32, i32
  }
  func.func @transform_4(%arg0: i32) -> (i32, i32) {
    %c0_i32 = arith.constant 0 : i32
    %c0_i32_0 = arith.constant 0 : i32
    %c0_i32_1 = arith.constant 0 : i32
    return %c0_i32, %c0_i32_0 : i32, i32
  }
  func.func @transform_5(%arg0: i32) -> (i32, i32) {
    %c0_i32 = arith.constant 0 : i32
    %c0_i32_0 = arith.constant 0 : i32
    %c0_i32_1 = arith.constant 0 : i32
    return %c0_i32, %c0_i32_0 : i32, i32
  }
  func.func @transform_6(%arg0: i32) -> (i32, i32) {
    %c0_i32 = arith.constant 0 : i32
    %c0_i32_0 = arith.constant 0 : i32
    %c0_i32_1 = arith.constant 0 : i32
    return %c0_i32, %c0_i32_0 : i32, i32
  }
  func.func @transform_7(%arg0: i32) -> (i32, i32) {
    %c0_i32 = arith.constant 0 : i32
    %c0_i32_0 = arith.constant 0 : i32
    return %c0_i32, %arg0 : i32, i32
  }
}

</mosaic_0001>

<bundles_post_ra>
// kernel: tpu_custom_call.1
= control target key start
LH: loop header
LB: loop body
LE: loop exit
PB: predicated region body
PF: predicated region fallthrough
CT: control target
= control target key end

     0   :  { %12 = vsyncpa [#allocation3], 0  ;;  %s980_s0 = inlined_call_operand.vmem [shape: f32[4,256], index: 0, kind: input, shape index: {}]   ;;  %s981_s1 = inlined_call_operand.vmem [shape: f32[8,12], index: 1, kind: input, shape index: {}]   ;;  %s982_s2 = inlined_call_operand.vmem [shape: f32[8,1], index: 2, kind: input, shape index: {}]   ;;  %s983_s3 = inlined_call_operand.vmem [shape: f32[8,24], index: 3, kind: input, shape index: {}]   ;;  %s984_s4 = inlined_call_operand.vmem [shape: f32[8,1], index: 4, kind: input, shape index: {}]   ;;  %s985_s5 = inlined_call_operand.vmem [shape: f32[8,4], index: 5, kind: input, shape index: {}]   ;;  %s986_s6 = inlined_call_operand.vmem [shape: f32[8,1], index: 6, kind: input, shape index: {}]   ;;  %s987_s7 = inlined_call_operand.hbm [shape: f32[8,256], index: 7, kind: output, shape index: {}]  }
   0x1   :  { %14 = vsyncpa [#allocation3 + $0x1], 0  ;;  %s851_s24 = smov 0   ;;  %s853_s25 = smov 0  }
   0x2   :  { %s855_s26 = smov 0   ;;  %s857_s27 = smov 0  }
   0x3 LB: > { %s872_s28 = sadd.s32 4294967295, %s801_s27   ;;  %s636_s29 = sadd.s32 4294967294, %s801_s27   ;;  %s801_s27 = sphi %s857_s27, %s993_s27   ;;  %s797_s26 = sphi %s855_s26, %s992_s26   ;;  %s793_s25 = sphi %s853_s25, %s991_s25   ;;  %s789_s24 = sphi %s851_s24, %s990_s24  }
   0x4   : > { %s876_s30 = sadd.s32 1, %s801_s27   ;;  %s179_s8 = sadd.s32 1, %s797_s26 }
   0x5   : > { %s176_s9 = ssub.s32 %s801_s27, %s876_s30  ;;  %p189_p0 = scmp.ne.s32.totalorder %s797_s26, %s793_s25 }
   0x6   : > { %p177_p1 = scmp.eq.s32.totalorder %s176_s9, 0  ;;  %p190_p2 = scmp.eq.s32.totalorder %s872_s28, 1 }
   0x7   : > { %p195_p3 = scmp.ne.s32.totalorder %s793_s25, %s789_s24  ;;  %p196_p4 = scmp.eq.s32.totalorder %s636_s29, 1 }
   0x8   : > { %s887_s10 = scalar_select %p177_p1, %s797_s26, %s179_s8  }
   0x9   : > { %p889_p5 = por %p190_p2, %p189_p0  ;;  %p893_p6 = por %p196_p4, %p195_p3 }
   0xa   : > { %p639_p7 = scmp.ge.s32.totalorder %s801_s27, 1  ;;  %p239_p8 = scmp.lt.s32.totalorder %s801_s27, 3 }
   0xc   : > { %p240_p9 = pnand %p639_p7, %p239_p8 }
   0xd   : > { %p270_p10 = scmp.lt.s32.totalorder (!%p240_p9), %s872_s28, 1  ;;  %v803_v0 = vmov (!%p240_p9), 0.0|0.0   ;;  %vm804_vm0 = vmmov (!%p240_p9), 0   ;;  %v805_v1 = vmov (!%p240_p9), 0.0   ;;  %v290_v2 = vld [vmem:[%s982_s2] sm:$0xff] (!%p240_p9)  ;;  %v806_v4 = vmov (!%p240_p9), 0  }
   0xe   : > { %243 = sbr.rel (%p240_p9) target bundleno = 724 (0x2d4), region = 48  ;;  %683 = vmatprep.subr.bf16.mxu0 (!%p240_p9), %v803_v0  ;;  %687 = vmatprep.subr.bf16.mxu1 (!%p240_p9), %v803_v0  ;;  %s807_s20 = smov (!%p240_p9), 2   ;;  %v275_v5 = vlaneseq (!%p240_p9)  ;;  %vm308_vm3 = vcmask (!%p240_p9), 1043456   ;;  %vm809_vm4 = vmmov (!%p240_p9), 1   ;;  %v289_v14 = vld [vmem:[%s981_s1] sm:$0xff] (!%p240_p9)  ;;  %vm315_vm6 = vcmask (!%p240_p9), 97280  }
   0xf   : > { %666 = vmatprep.mubr.msk.f32.mxu0 (!%p240_p9), %vm804_vm0, %v805_v1  ;;  %675 = vmatprep.mubr.msk.f32.mxu1 (!%p240_p9), %vm804_vm0, %v805_v1  ;;  %s808_s21 = smov (!%p240_p9), 4   ;;  %vm685_vm5 = vmpackc.low (!%p240_p9), %vm308_vm3, %vm809_vm4  ;;  %v479_v16 = vld [vmem:[%s985_s5] sm:$0xff] (!%p240_p9)  ;;  %vm486_vm7 = vcmask (!%p240_p9), 31744   ;;  %vm404_vm9 = vcmask (!%p240_p9), 195584   ;;  %s267_s18 = sand.u32 (!%p240_p9), 1, %s793_s25  }
  0x10   : > { %737 = vset.pattern.permute.xlu1 (!%p240_p9), %v806_v4  ;;  %738 = vset.pattern.permute.xlu0 (!%p240_p9), %v806_v4  ;;  %v276_v6 = vand.u32 (!%p240_p9), 127, %v275_v5  ;;  %v292_v21 = vld [vmem:[%s984_s4] sm:$0xff] (!%p240_p9)  ;;  %s640_s19 = sshll.u32 (!%p240_p9), %s267_s18, 3  ;;  %s564_s9 = scalar_lea.sflag (!%p240_p9), [#allocation3], %s267_s18 }
  0x11   : > { %312 = vperm.xlu1 (!%p240_p9), %737, %v290_v2   ;;  %v480_v22 = vld [vmem:[%s986_s6] sm:$0xff] (!%p240_p9) }
  0x12   : > { %vm301_vm1 = vcmp.ge.s32.totalorder (!%p240_p9), %v276_v6, 2  ;;  %vm295_vm2 = vcmp.ge.s32.totalorder (!%p240_p9), %v276_v6, 4  ;;  %v291_v26 = vld [vmem:[%s983_s3] sm:$0xff] (!%p240_p9) }
  0x13   : > { %vm689_vm8 = vmpackc.low (!%p240_p9), %vm301_vm1, %vm295_vm2 }
  0x15   : > { %s271_s13 = scalar_select %p270_p10, %s872_s28, 1 }
  0x17   : > { %s641_s14 = sshll.u32 %s271_s13, 2 }
  0x18   : > { %s273_s17 = scalar_lea.vmem %s980_s0, %s641_s14 }
  0x19   : > { %v274_v3 = vld [vmem:[%s273_s17] sm:$0xf] }
  0x1a   : > { %299 = vrot.lane.b32.xlu0 %v274_v3, %s807_s20 }
  0x1e   : > { %293 = vrot.lane.b32.xlu0 %v274_v3, %s808_s21 }
  0x8c   : > { %v300_v7 = vpop.permute.xlu0 %299 }
  0x8d   : > { %v304_v8 = vsel %vm301_vm1, %v300_v7, 0.0 }
  0x8e   : > { %v306_v9 = vrot.slane %v304_v8, 4 }
  0x90   : > { %v294_v10 = vpop.permute.xlu0 %293  ;;  %v313_v15 = vpop.permute.xlu1 %312 }
  0x91   : > { %v298_v11 = vsel %vm295_vm2, %v294_v10, 0.0 }
  0x92   : > { %v309_v12 = vsel %vm308_vm3, %v298_v11, %v306_v9 }
  0x93   : > { %v684_v13 = vpack.c.bf16 %v274_v3, %v309_v12 }
  0x95   : > { %686 = vmatpush3.bf16.msk.msra.mxu0 %vm685_vm5, %v684_v13 }
  0x96   : > { %678 = vmatprep.subr.mxu0 %v805_v1 }
  0x98   : > { %667 = vmatmul.mubr.msk.f32.vlgmr.msra.gmra.mrb[0].mxu0 %vm315_vm6, %v289_v14 }
  0x99   : > { %679 = vmatpush3.msk.msra.mxu0 %vm308_vm3, %v274_v3  ;;  %680 = vmatprep.mubr.msk.f32.mxu0 %vm804_vm0, %v805_v1 }
  0x9c   : > { %681 = vmatmul.mubr.msk.f32.vlgmr.msra.gmra.mrb[2].mxu0 %vm486_vm7, %v479_v16 }
 0x16b   : > { %v388_v17 = vpop.f32.mrb[0].mxu0 }
 0x16c   : > { %v389_v18 = vadd.f32 %v388_v17, %v313_v15  ;;  %v668_v19 = vpop.f32.mrb[1].mxu0 }
 0x16e   : > { %v392_v20 = vmax.f32 %v389_v18, 0.0 }
 0x16f   : > { %v556_v27 = vpop.f32.mrb[2].mxu0 }
 0x170   : > { %396 = vrot.lane.b32.xlu0 %v392_v20, %s807_s20  ;;  %393 = vrot.lane.b32.xlu1 %v392_v20, %s808_s21  ;;  %v682_v28 = vpop.f32.mrb[3].mxu0  ;;  %s650_s20 = sshll.u32 %s872_s28, 7  ;;  %s269_s21 = scalar_lea.vmem [#allocation2], %s640_s19 }
 0x171   : > { %s577_s22 = sshll.u32 %s269_s21, 4  ;;  %s938_s8 = scalar_lea.hbm %s987_s7, %s650_s20  ;;  %s940_s22 = int_to_ptr.vmem [resolvable:$true] %s577_s22 }
 0x172   : > { %s739_s13 = scalar_lea.vmem %s940_s22, 128  ;;  %s810_s28 = smov [#allocation2]  }
 0x173   : > { %p740_p11 = scmp.ne.s32.totalorder %s940_s22, %s739_s13  ;;  %s743_s14 = sshll.u32 %s810_s28, 4  ;;  %s744_s14 = int_to_ptr.vmem [resolvable:$false] %s743_s14 }
 0x174   : > { %401 = vperm.xlu1 %737, %v292_v21   ;;  %483 = vperm.xlu0 %738, %v480_v22   ;;  %s745_s15 = scalar_lea.vmem %s744_s14, 256  ;;  %p746_p0 = scmp.lt.s32.totalorder %s940_s22, %s744_s14 }
 0x175   : > { %p741_p12 = pnand %p740_p11, %p889_p5  ;;  %p747_p1 = scmp.lt.s32.totalorder %s745_s15, %s739_s13 }
 0x177   : > { %p742_p13 = pneg %p741_p12  ;;  %p748_p2 = por %p747_p1, %p746_p0 }
 0x179   : > { %p749_p3 = pnand %p748_p2, %p742_p13 }
 0x1e2   : > { %v397_v23 = vpop.permute.xlu0 %396  ;;  %v394_v24 = vpop.permute.xlu1 %393 }
 0x1e3   : > { %v688_v25 = vpack.c.bf16 %v397_v23, %v394_v24 }
 0x1e5   : > { %690 = vmatpush3.bf16.msk.msra.mxu1 %vm689_vm8, %v688_v25 }
 0x1e6   : > { %673 = vmatprep.subr.mxu1 %v805_v1 }
 0x1e9   : > { %674 = vmatpush3.msra.mxu1 %v392_v20 }
 0x1ea   : > { %676 = vmatmul.mubr.msk.f32.vlgmr.msra.gmra.mrb[0].mxu1 %vm404_vm9, %v291_v26 }
 0x1f3   : > { %v484_v29 = vpop.permute.xlu0 %483  ;;  %v402_v30 = vpop.permute.xlu1 %401 }
 0x1f4   : > { %v557_v34 = vadd.f32 %v556_v27, %v484_v29 }
 0x2bd   : > { %v474_v31 = vpop.f32.mrb[0].mxu1 }
 0x2be   : > { %v475_v32 = vadd.f32 %v474_v31, %v402_v30  ;;  %v677_v33 = vpop.f32.mrb[1].mxu1 }
 0x2c0   : > { %v478_v35 = vmax.f32 %v475_v32, 0.0 }
 0x2c2   : > { %v560_v36 = vadd.f32 %v557_v34, %v478_v35 }
 0x2c4   : > { %v561_v37 = vmax.f32 %v560_v36, 0.0 }
 0x2c6   : > { %562 = vst [vmem:[%s269_s21] sm:$0xff] %v561_v37 }
 0x2c7   : > { %752 = shalt.err (!%p749_p3)
}
 0x2c8   : > { %s753_s16 = scalar_lea.hbm %s938_s8, 128  ;;  %s757_s19 = scalar_lea.hbm %s987_s7, 256 }
 0x2c9   : > { %p754_p4 = scmp.ne.s32.totalorder %s938_s8, %s753_s16  ;;  %p758_p9 = scmp.lt.u32.totalorder %s938_s8, %s987_s7 }
 0x2ca   : > { %p759_p10 = scmp.lt.u32.totalorder %s757_s19, %s753_s16  ;;  %p761_p12 = scmp.lt.u32.totalorder %s753_s16, %s938_s8 }
 0x2cb   : > { %p755_p7 = pnand %p754_p4, %p889_p5 }
 0x2cc   : > { %p760_p11 = por %p759_p10, %p758_p9 }
 0x2cd   : > { %p756_p8 = pneg %p755_p7 }
 0x2ce   : > { %p762_p13 = por %p761_p12, %p760_p11 }
 0x2d0   : > { %p763_p0 = pnand %p762_p13, %p756_p8 }
 0x2d2   : > { %766 = shalt.err (!%p763_p0)
}
 0x2d3   : > { %691 = dma.vmem_to_hbm [thread:$0]  (%p889_p5), %s940_s22, 128, %s938_s8, %s564_s9  }
 0x2d4 PF: > { %p697_p1 = scmp.ge.s32.totalorder %s801_s27, 2  ;;  %s589_s23 = sand.u32 1, %s789_s24  }
 0x2d5   : > { %s590_s29 = scalar_lea.sflag [#allocation3], %s589_s23 }
 0x2d6   : > { %p694_p2 = pnand %p697_p1, %p893_p6 }
 0x2d8   : > { %784 = dma.done.wait (!%p694_p2), %s590_s29, 128  }
 0x2d9   : > { %786 = vsyncadd (!%p694_p2), %s590_s29, 4294967168  ;;  %p17_p3 = scmp.ge.s32.totalorder %s876_s30, 4   ;;  %s990_s24 = smov %s793_s25 }
 0x2da   : > { %s991_s25 = smov %s797_s26  ;;  %s992_s26 = smov %s887_s10 }
 0x2db   : > { %s993_s27 = smov %s876_s30  ;;  %19 = sbr.rel (!%p17_p3) target bundleno = 3 (0x3), region = 83 }
 0x2e2   :  { %595 = vsyncpa [#allocation3], 1 }
 0x2e3   :  { %597 = vsyncpa [#allocation3 + $0x1], 1 }

</bundles_post_ra>
